<compile_context>
chip_gen: v5e
topology: v5e:2x2
jax: 0.10.0
libtpu: 0.0.40
codegen_flags: <defaults>
</compile_context>

<pallas_src>
import functools

import jax
import jax.numpy as jnp
from jax.experimental import pallas as pl
from jax.experimental.pallas import tpu as pltpu

LANE = 128


def _round_up(x, m):
    return (x + m - 1) // m * m


def _pad_to(x, shape):
    return jnp.pad(x, [(0, s - d) for d, s in zip(x.shape, shape)])


def _vmem_budget_bytes():
    """Per-generation scoped-VMEM budget: ~75% of capacity, capped at 96 MiB."""
    try:
        cap = pltpu.get_tpu_info().vmem_capacity_bytes
    except Exception:
        cap = 64 << 20  # conservative (v7x-per-core-sized) fallback
    return int(min(cap * 3 // 4, 96 << 20))


def _choose_tm(n_pad):
    """Dst row-tile size: <= 512 rows, and >= 2 tiles when possible (v7x has 2 TCs)."""
    if n_pad <= 128:
        return n_pad
    for tm in (512, 256, 128):
        if n_pad % tm == 0 and n_pad // tm >= 2:
            return tm
    return 128


def _sage_layer_kernel(a_ref, invdeg_ref, hdst_ref, hall_ref, w_ref, b_ref,
                       o_ref, *, apply_relu):
    """One SAGEConv (mean aggregator) layer for one dst row-tile.

    a_ref      : (tm, n_pad)     bf16  adjacency strip A[dst_tile, :]
    invdeg_ref : (tm, 1)         f32   1 / in-degree (0 for isolated nodes)
    hdst_ref   : (tm, f_in)      bf16  self features of this dst tile (streamed)
    hall_ref   : (n_pad, f_in)   bf16  all node features (VMEM resident)
    w_ref      : (2*f_in, f_out) bf16  stacked [W_self ; W_neigh]
    b_ref      : (1, f_out)      f32   bias
    o_ref      : (tm, f_out)           output tile
    """
    # Neighbor sum on the MXU (bf16 x bf16 -> f32 accumulate), then exact f32 mean.
    neigh = jnp.dot(a_ref[...], hall_ref[...], preferred_element_type=jnp.float32)
    neigh = neigh * invdeg_ref[...]

    # Fused projection: [h_self | mean_neigh] @ [W_self ; W_neigh] + bias (f32 accumulate).
    stk = jnp.concatenate([hdst_ref[...], neigh.astype(jnp.bfloat16)], axis=1)
    out = jnp.dot(stk, w_ref[...], preferred_element_type=jnp.float32) + b_ref[...]
    if apply_relu:
        out = jnp.maximum(out, 0.0)
    o_ref[...] = out.astype(o_ref.dtype)


def sage_conv(adj_bf16, inv_deg, h, w_stacked, bias2d, *, apply_relu, tm, out_dtype):
    """One SAGEConv layer as a tiled, pipelined Pallas call (all inputs pre-padded)."""
    n_pad, f_in = h.shape
    f_out = w_stacked.shape[1]
    assert n_pad % tm == 0
    grid = (n_pad // tm,)
    out_bytes = 4 if out_dtype == jnp.float32 else 2

    # Working-set accounting (streamed blocks double-buffered by the pipeline; the
    # constant-index residents are counted once each -- Mosaic does not need to rotate them,
    # and pl.Buffered(1) is deliberately not requested to keep lowering maximally portable).
    ws = (2 * tm * n_pad * 2          # A strip, double-buffered, bf16
          + 2 * tm * 4                # inv-degree tile
          + 2 * tm * f_in * 2         # streamed h_dst, bf16
          + n_pad * f_in * 2          # resident h_all, bf16
          + 2 * f_in * f_out * 2      # resident stacked weights, bf16
          + f_out * 4                 # bias
          + 2 * tm * f_out * out_bytes)  # output tile, double-buffered
    vmem_limit = int(min(max(2 * ws, 8 << 20), _vmem_budget_bytes()))

    # Advisory cost estimate matching the real streaming pattern (A once per layer, bf16).
    cost = pl.CostEstimate(
        flops=2 * n_pad * n_pad * f_in + 2 * n_pad * (2 * f_in) * f_out,
        transcendentals=0,
        bytes_accessed=int(n_pad * n_pad * 2          # A (bf16), streamed once
                           + 2 * n_pad * f_in * 2     # h_all resident + h_dst stream
                           + 2 * f_in * f_out * 2     # stacked W
                           + n_pad * f_out * out_bytes
                           + n_pad * 4 + f_out * 4),
    )

    kernel = functools.partial(_sage_layer_kernel, apply_relu=apply_relu)
    return pl.pallas_call(
        kernel,
        out_shape=jax.ShapeDtypeStruct((n_pad, f_out), out_dtype),
        grid_spec=pltpu.PrefetchScalarGridSpec(
            num_scalar_prefetch=0,
            grid=grid,
            in_specs=[
                pl.BlockSpec((tm, n_pad), lambda i: (i, 0)),         # A strip (streamed)
                pl.BlockSpec((tm, 1), lambda i: (i, 0)),             # 1/in-degree
                pl.BlockSpec((tm, f_in), lambda i: (i, 0)),          # h_dst (streamed)
                pl.BlockSpec((n_pad, f_in), lambda i: (0, 0)),       # h_all (resident)
                pl.BlockSpec((2 * f_in, f_out), lambda i: (0, 0)),   # W (resident)
                pl.BlockSpec((1, f_out), lambda i: (0, 0)),          # bias (resident)
            ],
            out_specs=pl.BlockSpec((tm, f_out), lambda i: (i, 0)),
        ),
        compiler_params=pltpu.CompilerParams(
            dimension_semantics=("parallel",),
            vmem_limit_bytes=vmem_limit,
        ),
        cost_estimate=cost,
    )(adj_bf16, inv_deg, h, h, w_stacked, bias2d)


def prepare_params(params_raw):
    """Pad weights to 128-lane widths, stack [W_self; W_neigh] in bf16; bias -> (1, F_out_pad) f32."""
    prepared = []
    for w_self, w_neigh, bias in params_raw:
        fin, fout = w_self.shape
        fpi, fpo = _round_up(fin, LANE), _round_up(fout, LANE)
        w_stacked = jnp.concatenate(
            [_pad_to(w_self, (fpi, fpo)), _pad_to(w_neigh, (fpi, fpo))],
            axis=0).astype(jnp.bfloat16)
        b2 = _pad_to(bias.reshape(1, fout), (1, fpo)).astype(jnp.float32)
        prepared.append((w_stacked, b2, fout))
    return prepared


def graphsage_forward(adj, inv_deg, inputs, params_raw):
    """GraphSAGE.forward. params_raw: list of (w_self[fi,fo], w_neigh[fi,fo], bias[fo])."""
    n, in_feats = inputs.shape
    n_pad = _round_up(n, LANE)
    tm = _choose_tm(n_pad)

    f_in_pad = _round_up(in_feats, LANE)
    adj_p = _pad_to(adj, (n_pad, n_pad)).astype(jnp.bfloat16)    # 0/1 -> lossless bf16
    invdeg_p = _pad_to(inv_deg, (n_pad, 1)).astype(jnp.float32)
    h = _pad_to(inputs, (n_pad, f_in_pad)).astype(jnp.bfloat16)  # dropout == identity (eval)

    params = prepare_params(params_raw)
    n_total = len(params)
    prior = None
    final_fout = params[-1][2]
    for l, (w_stacked, bias2d, fout) in enumerate(params):
        is_last = (l == n_total - 1)
        out_dtype = jnp.float32 if is_last else jnp.bfloat16
        h = sage_conv(adj_p, invdeg_p, h, w_stacked, bias2d,
                      apply_relu=not is_last, tm=tm, out_dtype=out_dtype)
        if l == n_total - 2:
            prior = h[:n, :fout].astype(jnp.float32)
    return h[:n, :final_fout], prior


def init_params(key, in_feats, n_hidden, n_classes, n_layers):
    """Deterministic xavier-uniform init (DGL SAGEConv default), bias zeros."""
    dims = [(in_feats, n_hidden)]
    for _ in range(n_layers - 1):
        dims.append((n_hidden, n_hidden))
    dims.append((n_hidden, n_classes))

    params = []
    for (fin, fout) in dims:
        key, k1, k2 = jax.random.split(key, 3)
        limit = jnp.sqrt(6.0 / (fin + fout))
        w_self = jax.random.uniform(k1, (fin, fout), jnp.float32, -limit, limit)
        w_neigh = jax.random.uniform(k2, (fin, fout), jnp.float32, -limit, limit)
        bias = jnp.zeros((fout,), jnp.float32)
        params.append((w_self, w_neigh, bias))
    return params


def make_graph(key, n_nodes, avg_degree=4):
    """Deterministic random dense adjacency [dst, src] and inverse in-degree [N, 1]."""
    p = avg_degree / n_nodes
    adj = (jax.random.uniform(key, (n_nodes, n_nodes)) < p).astype(jnp.float32)
    adj = adj * (1.0 - jnp.eye(n_nodes, dtype=jnp.float32))  # no self loops
    deg = adj.sum(axis=1, keepdims=True)                     # in-degree per dst node
    inv_deg = jnp.where(deg > 0, 1.0 / jnp.maximum(deg, 1.0), 0.0).astype(jnp.float32)
    return adj, inv_deg


if __name__ == "__main__":
    # 256 nodes (=> dst grid of 2 tiles), in_feats=16, hidden=32, classes=8,
    # n_layers=2 (=> 3 SAGEConv layers, as in the PyTorch constructor).
    N, IN_FEATS, N_HIDDEN, N_CLASSES, N_LAYERS = 256, 16, 32, 8, 2

    key = jax.random.PRNGKey(0)
    k_graph, k_feat, k_param = jax.random.split(key, 3)

    adj, inv_deg = make_graph(k_graph, N)
    x = jax.random.normal(k_feat, (N, IN_FEATS), jnp.float32)
    params = init_params(k_param, IN_FEATS, N_HIDDEN, N_CLASSES, N_LAYERS)

    h_out, prior = graphsage_forward(adj, inv_deg, x, params)
    jax.block_until_ready((h_out, prior))

    assert h_out.shape == (N, N_CLASSES)
    assert prior.shape == (N, N_HIDDEN)
    print("KERNEL_OK")
</pallas_src>

<mosaic_0001>
module attributes {stable_mosaic.version = 11 : i64} {
  func.func @_sage_layer_kernel(%arg0: i32, %arg1: memref<128x256xbf16, #tpu.memory_space<vmem>>, %arg2: memref<128x1xf32, #tpu.memory_space<vmem>>, %arg3: memref<128x128xbf16, #tpu.memory_space<vmem>>, %arg4: memref<256x128xbf16, #tpu.memory_space<vmem>>, %arg5: memref<256x128xbf16, #tpu.memory_space<vmem>>, %arg6: memref<1x128xf32, #tpu.memory_space<vmem>>, %arg7: memref<128x128xbf16, #tpu.memory_space<vmem>>) attributes {dimension_semantics = [#tpu.dimension_semantics<parallel>], iteration_bounds = array<i64: 2>, scalar_prefetch = 0 : i64, scratch_operands = 0 : i64, tpu.core_type = #tpu.core_type<tc>, window_params = [{transform_indices = @transform_0, window_bounds = array<i64: 128, 256>}, {transform_indices = @transform_1, window_bounds = array<i64: 128, 1>}, {transform_indices = @transform_2, window_bounds = array<i64: 128, 128>}, {pipeline_mode = #tpu.pipeline_mode<synchronous>, transform_indices = @transform_3, window_bounds = array<i64: 256, 128>}, {pipeline_mode = #tpu.pipeline_mode<synchronous>, transform_indices = @transform_4, window_bounds = array<i64: 256, 128>}, {pipeline_mode = #tpu.pipeline_mode<synchronous>, transform_indices = @transform_5, window_bounds = array<i64: 1, 128>}, {transform_indices = @transform_6, window_bounds = array<i64: 128, 128>}]} {
    %c0 = arith.constant 0 : index
    %c0_0 = arith.constant 0 : index
    %0 = vector.load %arg1[%c0, %c0_0] : memref<128x256xbf16, #tpu.memory_space<vmem>>, vector<128x256xbf16>
    %c0_1 = arith.constant 0 : index
    %c0_2 = arith.constant 0 : index
    %1 = vector.load %arg4[%c0_1, %c0_2] : memref<256x128xbf16, #tpu.memory_space<vmem>>, vector<256x128xbf16>
    %cst = arith.constant dense<0.000000e+00> : vector<128x128xf32>
    %2 = tpu.matmul %0, %1, %cst {dimension_numbers = #tpu.dot_dimension_numbers<[1], [0], [0], [1], [0, 0, 1, 1], [], []>} : vector<128x256xbf16>, vector<256x128xbf16>, vector<128x128xf32> -> vector<128x128xf32>
    %c0_3 = arith.constant 0 : index
    %c0_4 = arith.constant 0 : index
    %3 = vector.load %arg2[%c0_3, %c0_4] : memref<128x1xf32, #tpu.memory_space<vmem>>, vector<128x1xf32>
    %4 = vector.broadcast %3 : vector<128x1xf32> to vector<128x128xf32>
    %5 = arith.mulf %2, %4 : vector<128x128xf32>
    %c0_5 = arith.constant 0 : index
    %c0_6 = arith.constant 0 : index
    %6 = vector.load %arg3[%c0_5, %c0_6] : memref<128x128xbf16, #tpu.memory_space<vmem>>, vector<128x128xbf16>
    %7 = arith.truncf %5 : vector<128x128xf32> to vector<128x128xbf16>
    %8 = tpu.concatenate %6, %7 in 1 : vector<128x128xbf16>, vector<128x128xbf16> -> vector<128x256xbf16>
    %c0_7 = arith.constant 0 : index
    %c0_8 = arith.constant 0 : index
    %9 = vector.load %arg5[%c0_7, %c0_8] : memref<256x128xbf16, #tpu.memory_space<vmem>>, vector<256x128xbf16>
    %cst_9 = arith.constant dense<0.000000e+00> : vector<128x128xf32>
    %10 = tpu.matmul %8, %9, %cst_9 {dimension_numbers = #tpu.dot_dimension_numbers<[1], [0], [0], [1], [0, 0, 1, 1], [], []>} : vector<128x256xbf16>, vector<256x128xbf16>, vector<128x128xf32> -> vector<128x128xf32>
    %c0_10 = arith.constant 0 : index
    %c0_11 = arith.constant 0 : index
    %11 = vector.load %arg6[%c0_10, %c0_11] : memref<1x128xf32, #tpu.memory_space<vmem>>, vector<1x128xf32>
    %12 = vector.broadcast %11 : vector<1x128xf32> to vector<128x128xf32>
    %13 = arith.addf %10, %12 : vector<128x128xf32>
    %cst_12 = arith.constant 0.000000e+00 : f32
    %14 = vector.broadcast %cst_12 : f32 to vector<128x128xf32>
    %15 = arith.maximumf %13, %14 : vector<128x128xf32>
    %16 = arith.truncf %15 : vector<128x128xf32> to vector<128x128xbf16>
    %c0_13 = arith.constant 0 : index
    %c0_14 = arith.constant 0 : index
    %17 = vector.load %arg7[%c0_13, %c0_14] : memref<128x128xbf16, #tpu.memory_space<vmem>>, vector<128x128xbf16>
    tpu.vector_store %arg7[%c0_13, %c0_14], %16 {strides = array<i32>} : memref<128x128xbf16, #tpu.memory_space<vmem>>, vector<128x128xbf16>,
    return
  }
  func.func @transform_0(%arg0: i32) -> (i32, i32) {
    %c0_i32 = arith.constant 0 : i32
    %c0_i32_0 = arith.constant 0 : i32
    return %arg0, %c0_i32 : i32, i32
  }
  func.func @transform_1(%arg0: i32) -> (i32, i32) {
    %c0_i32 = arith.constant 0 : i32
    %c0_i32_0 = arith.constant 0 : i32
    return %arg0, %c0_i32 : i32, i32
  }
  func.func @transform_2(%arg0: i32) -> (i32, i32) {
    %c0_i32 = arith.constant 0 : i32
    %c0_i32_0 = arith.constant 0 : i32
    return %arg0, %c0_i32 : i32, i32
  }
  func.func @transform_3(%arg0: i32) -> (i32, i32) {
    %c0_i32 = arith.constant 0 : i32
    %c0_i32_0 = arith.constant 0 : i32
    %c0_i32_1 = arith.constant 0 : i32
    return %c0_i32, %c0_i32_0 : i32, i32
  }
  func.func @transform_4(%arg0: i32) -> (i32, i32) {
    %c0_i32 = arith.constant 0 : i32
    %c0_i32_0 = arith.constant 0 : i32
    %c0_i32_1 = arith.constant 0 : i32
    return %c0_i32, %c0_i32_0 : i32, i32
  }
  func.func @transform_5(%arg0: i32) -> (i32, i32) {
    %c0_i32 = arith.constant 0 : i32
    %c0_i32_0 = arith.constant 0 : i32
    %c0_i32_1 = arith.constant 0 : i32
    return %c0_i32, %c0_i32_0 : i32, i32
  }
  func.func @transform_6(%arg0: i32) -> (i32, i32) {
    %c0_i32 = arith.constant 0 : i32
    %c0_i32_0 = arith.constant 0 : i32
    return %arg0, %c0_i32 : i32, i32
  }
}

</mosaic_0001>

<bundles_post_ra>
// kernel: tpu_custom_call.1
= control target key start
LH: loop header
LB: loop body
LE: loop exit
PB: predicated region body
PF: predicated region fallthrough
CT: control target
= control target key end

     0   :  { %11 = vsyncpa [#allocation3], 0  ;;  %s2221_s0 = inlined_call_operand.vmem [shape: bf16[256,256], index: 0, kind: input, shape index: {}]   ;;  %s2222_s1 = inlined_call_operand.vmem [shape: f32[256,1], index: 1, kind: input, shape index: {}]   ;;  %s2223_s2 = inlined_call_operand.hbm [shape: bf16[256,128], index: 2, kind: input, shape index: {}]   ;;  %s2224_s3 = inlined_call_operand.hbm [shape: bf16[256,128], index: 3, kind: input, shape index: {}]   ;;  %s2225_s4 = inlined_call_operand.hbm [shape: bf16[256,128], index: 4, kind: input, shape index: {}]   ;;  %s2226_s5 = inlined_call_operand.vmem [shape: f32[1,128], index: 5, kind: input, shape index: {}]   ;;  %s2227_s6 = inlined_call_operand.hbm [shape: bf16[256,128], index: 6, kind: output, shape index: {}]  }
   0x1   :  { %13 = vsyncpa [#allocation3 + $0x1], 0 }
   0x2   :  { %14 = vsyncpa [#allocation6], 0 }
   0x3   :  { %15 = vsyncpa [#allocation4], 0 }
   0x4   :  { %17 = vsyncpa [#allocation4 + $0x1], 0  ;;  %s1959_s21 = smov 0   ;;  %s1961_s22 = smov 0  }
   0x5   :  { %s1963_s23 = smov 0   ;;  %s1965_s24 = smov 0  }
   0x6 LB: > { %s1980_s25 = sadd.s32 4294967295, %s1915_s24   ;;  %s1326_s26 = sadd.s32 4294967294, %s1915_s24   ;;  %s1915_s24 = sphi %s1965_s24, %s2241_s24   ;;  %s1911_s23 = sphi %s1963_s23, %s2240_s23   ;;  %s1907_s22 = sphi %s1961_s22, %s2239_s22   ;;  %s1903_s21 = sphi %s1959_s21, %s2238_s21  }
   0x7   : > { %p95_p0 = scmp.ne.s32.totalorder %s1907_s22, %s1903_s21  ;;  %p96_p1 = scmp.eq.s32.totalorder %s1980_s25, 0 }
   0x8   : > { %p182_p2 = scmp.eq.s32.totalorder %s1980_s25, 1  ;;  %p188_p3 = scmp.eq.s32.totalorder %s1326_s26, 1 }
   0x9   : > { %p1989_p4 = por %p96_p1, %p95_p0  ;;  %p1327_p5 = scmp.ge.s32.totalorder %s1915_s24, 1 }
   0xa   : > { %p1994_p6 = por %p188_p3, %p95_p0  ;;  %p195_p7 = scmp.lt.s32.totalorder %s1915_s24, 3 }
   0xb   : > { %s206_s7 = sshll.u32 %s2224_s3, 4  ;;  %s1917_s9 = smov [#allocation5]   ;;  %s207_s7 = int_to_ptr.hbm [resolvable:$true] %s206_s7 }
   0xc   : > { %p2002_p8 = pnand %p1327_p5, %p195_p7  ;;  %s208_s10 = sshll.u32 %s1917_s9, 4  ;;  %s209_s10 = int_to_ptr.vmem [resolvable:$true] %s208_s10 }
   0xd   : > { %s220_s13 = sshll.u32 %s2225_s4, 4  ;;  %s2228_s14 = smov 64   ;;  %s221_s13 = int_to_ptr.hbm [resolvable:$true] %s220_s13 }
   0xe   : > { %p1691_p9 = pneg %p2002_p8  ;;  %s2229_s15 = smov 4  }
   0xf   : > { %s1920_s16 = smov [#allocation7]   ;;  %s2021_s18 = sadd.s32 1, %s1915_s24  }
  0x10   : > { %p1692_p10 = pnand %p1691_p9, %p96_p1  ;;  %s222_s17 = sshll.u32 %s1920_s16, 4  ;;  %s223_s17 = int_to_ptr.vmem [resolvable:$true] %s222_s17 }
  0x11   : > { %s82_s19 = sadd.s32 1, %s1911_s23  ;;  %s79_s20 = ssub.s32 %s1915_s24, %s2021_s18 }
  0x12   : > { %1694 = dma.hbm_to_vmem [thread:$0]  (!%p1692_p10), %s207_s7, 2048, %s209_s10, [#allocation6], %s2228_s14, %s2228_s14, %s2229_s15  }
  0x13   : > { %1697 = dma.hbm_to_vmem [thread:$0]  (!%p1692_p10), %s221_s13, 2048, %s223_s17, [#allocation6], %s2228_s14, %s2228_s14, %s2229_s15  }
  0x14   : > { %p89_p12 = scmp.ne.s32.totalorder %s1911_s23, %s1907_s22  ;;  %p80_p13 = scmp.eq.s32.totalorder %s79_s20, 0 }
  0x15   : > { %p90_p0 = scmp.eq.s32.totalorder %s1915_s24, 0  ;;  %p1708_p5 = scmp.lt.s32.totalorder %s1915_s24, 2 }
  0x16   : > { %p2031_p3 = por %p182_p2, %p89_p12  ;;  %s258_s30 = sand.u32 1, %s1911_s23  }
  0x17   : > { %s2037_s29 = scalar_select %p80_p13, %s1911_s23, %s82_s19  }
  0x18   : > { %p91_p7 = por %p90_p0, %p89_p12  ;;  %s1331_s7 = sshll.u32 %s258_s30, 6 }
  0x19   : > { %s1573_s9 = sshll.u32 %s1915_s24, 6  ;;  %s262_s13 = scalar_lea.vmem [#allocation2], %s1331_s7 }
  0x1a   : > { %s267_s12 = scalar_lea.hbm %s2223_s2, %s1573_s9  ;;  %s270_s16 = sshll.u32 %s262_s13, 4  ;;  %s271_s16 = int_to_ptr.vmem [resolvable:$true] %s270_s16 }
  0x1b   : > { %s268_s17 = sshll.u32 %s267_s12, 4  ;;  %p2044_p2 = pnand %p1708_p5, %p91_p7  ;;  %s269_s17 = int_to_ptr.hbm [resolvable:$true] %s268_s17 }
  0x1c   : > { %s259_s19 = scalar_lea.sflag [#allocation3], %s258_s30  ;;  %s1815_s14 = sshra.s32 %s269_s17, 4  ;;  %s1816_s14 = int_to_ptr.hbm [resolvable:$true] %s1815_s14 }
  0x1d   : > { %s1817_s15 = scalar_lea.hbm %s1816_s14, 64  ;;  %p1819_p10 = pneg %p2044_p2 }
  0x1e   : > { %p1818_p9 = scmp.ne.s32.totalorder %s1816_s14, %s1817_s15  ;;  %s1822_s10 = scalar_lea.hbm %s2223_s2, 128 }
  0x1f   : > { %p1823_p0 = scmp.lt.s32.totalorder %s1816_s14, %s2223_s2  ;;  %p1824_p5 = scmp.lt.s32.totalorder %s1822_s10, %s1817_s15 }
  0x20   : > { %p1820_p12 = pnand %p1819_p10, %p1818_p9 }
  0x21   : > { %p1825_p7 = por %p1824_p5, %p1823_p0 }
  0x22   : > { %p1821_p13 = pneg %p1820_p12 }
  0x24   : > { %p1826_p11 = pnand %p1825_p7, %p1821_p13 }
  0x26   : > { %1829 = shalt.err (!%p1826_p11)
}
  0x27   : > { %s2235_s30 = smov 4   ;;  %s2236_s13 = smov 64  }
  0x28   : > { %1701 = dma.hbm_to_vmem [thread:$0]  (!%p2044_p2), %s269_s17, 1024, %s271_s16, %s259_s19, %s2236_s13, %s2236_s13, %s2235_s30  }
  0x29   : > { %282 = sbr.rel (%p2002_p8) target bundleno = 489 (0x1e9), region = 44  ;;  %s2064_s9 = sand.u32 (!%p2002_p8), 1, %s1907_s22  }
  0x2a   : > { %s1335_s14 = sshll.u32 (!%p2002_p8), %s2064_s9, 6  ;;  %s285_s15 = scalar_lea.sflag (!%p2002_p8), [#allocation3], %s2064_s9 }
  0x2b   : > { %s2070_s7 = scalar_lea.vmem (!%p2002_p8), [#allocation2], %s1335_s14 }
  0x2e   : > { %1890 = dma.done.wait (%p1989_p4), %s285_s15, 1024  }
  0x2f   : > { %1892 = vsyncadd (%p1989_p4), %s285_s15, 4294966272 }
  0x30   : > { %1894 = dma.done.wait (%p96_p1), [#allocation6], 4096  }
  0x31   : > { %1896 = vsyncadd (%p96_p1), [#allocation6], 4294963200  ;;  %s1339_s8 = sshll.u32 %s1980_s25, 4  ;;  %v1921_v0 = vmov 0   ;;  %v1598_v1 = vld [vmem:[#allocation5 + $0x38] sm:$0xff]  ;;  %v1597_v4 = vld [vmem:[#allocation5 + $0x30] sm:$0xff] }
  0x32   : > { %1751 = vset.pattern.permute.xlu0 %v1921_v0  ;;  %p340_p8 = scmp.lt.s32.totalorder %s1339_s8, 31  ;;  %1752 = vset.pattern.permute.xlu1 %v1921_v0  ;;  %v1606_v2 = vld [vmem:[#allocation5 + $0x78] sm:$0xff]  ;;  %v1605_v5 = vld [vmem:[#allocation5 + $0x70] sm:$0xff]  ;;  %v1596_v7 = vld [vmem:[#allocation5 + $0x28] sm:$0xff]  ;;  %s2163_s13 = scalar_lea.vmem [#allocation8], %s1335_s14 }
  0x33   : > { %1753 = vset.pattern.permute.xlu2 %v1921_v0  ;;  %578 = vmatpush.bf16.msra.mxu0 %v1598_v1  ;;  %v1604_v8 = vld [vmem:[#allocation5 + $0x68] sm:$0xff]  ;;  %v1595_v10 = vld [vmem:[#allocation5 + $0x20] sm:$0xff]  ;;  %v1594_v13 = vld [vmem:[#allocation5 + $0x18] sm:$0xff]  ;;  %s1631_s14 = sshll.u32 %s1980_s25, 6  ;;  %s1195_s25 = scalar_lea.sflag [#allocation4], %s2064_s9 }
  0x34   : > { %s2243_s8 = smov (!%p340_p8, %s1339_s8), 31  ;;  %627 = vmatpush.bf16.msra.mxu1 %v1606_v2  ;;  %v1603_v11 = vld [vmem:[#allocation5 + $0x60] sm:$0xff]  ;;  %v1602_v14 = vld [vmem:[#allocation5 + $0x58] sm:$0xff]  ;;  %v1593_v16 = vld [vmem:[#allocation5 + $0x10] sm:$0xff] }
  0x35   : > { %s1574_s16 = sshll.u32 %s2243_s8, 3  ;;  %v1601_v17 = vld [vmem:[#allocation5 + $0x50] sm:$0xff]  ;;  %v1592_v19 = vld [vmem:[#allocation5 + $0x8] sm:$0xff]  ;;  %v1591_v22 = vld [vmem:[#allocation5] sm:$0xff]  ;;  %s1206_s8 = scalar_lea.hbm %s2227_s6, %s1631_s14 }
  0x36   : > { %s2089_s20 = scalar_lea.vmem %s2222_s1, %s1574_s16  ;;  %s2102_s11 = scalar_lea.vmem %s2221_s0, %s1574_s16  ;;  %v1600_v20 = vld [vmem:[#allocation5 + $0x48] sm:$0xff]  ;;  %v1599_v23 = vld [vmem:[#allocation5 + $0x40] sm:$0xff]  ;;  %v1622_v63 = vld [vmem:[#allocation7 + $0x38] sm:$0xff] }
  0x37   : > { %v676_v3 = vld [vmem:[%s2089_s20] sm:$0xff]  ;;  %v678_v6 = vld [vmem:[%s2089_s20 + $0x10] sm:$0xff]  ;;  %579 = vmatpush.bf16.msra.mxu0 %v1597_v4  ;;  %v677_v9 = vld [vmem:[%s2089_s20 + $0x8] sm:$0xff]  ;;  %1048 = vmatpush.bf16.msra.mxu2 %v1622_v63  ;;  %s1207_s16 = sshll.u32 %s2163_s13, 4  ;;  %s1209_s27 = sshll.u32 %s1206_s8, 4  ;;  %s1208_s16 = int_to_ptr.vmem [resolvable:$true] %s1207_s16  ;;  %s1210_s27 = int_to_ptr.hbm [resolvable:$true] %s1209_s27 }
  0x38   : > { %694 = vperm.xlu0 %1751, %v676_v3   ;;  %628 = vmatpush.bf16.msra.mxu1 %v1605_v5  ;;  %v679_v12 = vld [vmem:[%s2089_s20 + $0x18] sm:$0xff]  ;;  %v682_v15 = vld [vmem:[%s2089_s20 + $0x30] sm:$0xff]  ;;  %v685_v21 = vld [vmem:[%s2089_s20 + $0x48] sm:$0xff]  ;;  %s1859_s17 = sshra.s32 %s1210_s27, 4  ;;  %s1860_s17 = int_to_ptr.hbm [resolvable:$true] %s1859_s17 }
  0x39   : > { %704 = vperm.xlu1 %1752, %v678_v6   ;;  %v683_v18 = vld [vmem:[%s2089_s20 + $0x38] sm:$0xff]  ;;  %v1346_v24 = vld [vmem:[%s2102_s11] sm:$0xf]  ;;  %v1576_v25 = vld [vmem:[%s2102_s11 + $0x4] sm:$0xf0]  ;;  %p1866_p2 = scmp.lt.s32.totalorder %s1860_s17, %s2227_s6 }
  0x3a   : > { %v1575_v26 = vld [vmem:[%s2102_s11 + $0x4] sm:$0xf]  ;;  %v1348_v27 = vld [vmem:[%s2102_s11 + $0x8] sm:$0xf0]  ;;  %v686_v28 = vld [vmem:[%s2089_s20 + $0x50] sm:$0xff]  ;;  %v1347_v29 = vor.u32 %v1576_v25, %v1346_v24 }
  0x3b   : > { %580 = vmatpush.bf16.msra.mxu0 %v1596_v7  ;;  %v1351_v30 = vor.u32 %v1575_v26, %v1348_v27  ;;  %v688_v31 = vld [vmem:[%s2089_s20 + $0x60] sm:$0xff]  ;;  %v689_v33 = vld [vmem:[%s2089_s20 + $0x68] sm:$0xff]  ;;  %v691_v34 = vld [vmem:[%s2089_s20 + $0x78] sm:$0xff] }
  0x3c   : > { %629 = vmatpush.bf16.msra.mxu1 %v1604_v8  ;;  %v680_v32 = vld [vmem:[%s2089_s20 + $0x20] sm:$0xff]  ;;  %v681_v35 = vld [vmem:[%s2089_s20 + $0x28] sm:$0xff]  ;;  %v1354_v36 = vld [vmem:[%s2102_s11 + $0x10] sm:$0xf] }
  0x3d   : > { %714 = vperm.xlu2 %1753, %v680_v32   ;;  %v1578_v37 = vld [vmem:[%s2102_s11 + $0x14] sm:$0xf0]  ;;  %v1577_v38 = vld [vmem:[%s2102_s11 + $0x14] sm:$0xf]  ;;  %v1356_v39 = vld [vmem:[%s2102_s11 + $0x18] sm:$0xf0] }
  0x3e   : > { %v1355_v40 = vor.u32 %v1578_v37, %v1354_v36  ;;  %v1359_v41 = vor.u32 %v1577_v38, %v1356_v39  ;;  %v684_v42 = vld [vmem:[%s2089_s20 + $0x40] sm:$0xff]  ;;  %v687_v43 = vld [vmem:[%s2089_s20 + $0x58] sm:$0xff]  ;;  %v1580_v45 = vld [vmem:[%s2102_s11 + $0x24] sm:$0xf0] }
  0x3f   : > { %581 = vmatpush.bf16.msra.mxu0 %v1595_v10  ;;  %v1362_v44 = vld [vmem:[%s2102_s11 + $0x20] sm:$0xf]  ;;  %v1579_v46 = vld [vmem:[%s2102_s11 + $0x24] sm:$0xf]  ;;  %v1364_v47 = vld [vmem:[%s2102_s11 + $0x28] sm:$0xf0] }
  0x40   : > { %699 = vperm.xlu0 %1751, %v677_v9   ;;  %630 = vmatpush.bf16.msra.mxu1 %v1603_v11  ;;  %v1363_v48 = vor.u32 %v1580_v45, %v1362_v44  ;;  %v1367_v49 = vor.u32 %v1579_v46, %v1364_v47  ;;  %v690_v50 = vld [vmem:[%s2089_s20 + $0x70] sm:$0xff]  ;;  %v1582_v52 = vld [vmem:[%s2102_s11 + $0x34] sm:$0xf0]  ;;  %v1372_v54 = vld [vmem:[%s2102_s11 + $0x38] sm:$0xf0]  ;;  %s1861_s20 = scalar_lea.hbm %s1860_s17, 64 }
  0x41   : > { %709 = vperm.xlu1 %1752, %v679_v12   ;;  %v1370_v51 = vld [vmem:[%s2102_s11 + $0x30] sm:$0xf]  ;;  %v1581_v53 = vld [vmem:[%s2102_s11 + $0x34] sm:$0xf]  ;;  %v1378_v57 = vld [vmem:[%s2102_s11 + $0x40] sm:$0xf]  ;;  %p1862_p1 = scmp.ne.s32.totalorder %s1860_s17, %s1861_s20 }
  0x42   : > { %v1371_v55 = vor.u32 %v1582_v52, %v1370_v51  ;;  %v1375_v56 = vor.u32 %v1581_v53, %v1372_v54  ;;  %v1584_v58 = vld [vmem:[%s2102_s11 + $0x44] sm:$0xf0]  ;;  %v1583_v59 = vld [vmem:[%s2102_s11 + $0x44] sm:$0xf]  ;;  %v1380_v60 = vld [vmem:[%s2102_s11 + $0x48] sm:$0xf0] }
  0x43   : > { %582 = vmatpush.bf16.msra.mxu0 %v1594_v13  ;;  %v1379_v61 = vor.u32 %v1584_v58, %v1378_v57  ;;  %v1383_v62 = vor.u32 %v1583_v59, %v1380_v60  ;;  %v1621_v0 = vld [vmem:[#allocation7 + $0x30] sm:$0xff]  ;;  %v1620_v1 = vld [vmem:[#allocation7 + $0x28] sm:$0xff]  ;;  %v1586_v3 = vld [vmem:[%s2102_s11 + $0x54] sm:$0xf0]  ;;  %p1863_p4 = pnand %p1862_p1, %p2031_p3 }
  0x44   : > { %631 = vmatpush.bf16.msra.mxu1 %v1602_v14  ;;  %1049 = vmatpush.bf16.msra.mxu2 %v1621_v0  ;;  %v1386_v2 = vld [vmem:[%s2102_s11 + $0x50] sm:$0xf]  ;;  %v1585_v4 = vld [vmem:[%s2102_s11 + $0x54] sm:$0xf]  ;;  %v1388_v5 = vld [vmem:[%s2102_s11 + $0x58] sm:$0xf0] }
  0x45   : > { %719 = vperm.xlu2 %1753, %v681_v35   ;;  %v1387_v6 = vor.u32 %v1586_v3, %v1386_v2  ;;  %v1391_v7 = vor.u32 %v1585_v4, %v1388_v5  ;;  %v1630_v8 = vld [vmem:[#allocation7 + $0x78] sm:$0xff]  ;;  %v1619_v9 = vld [vmem:[#allocation7 + $0x20] sm:$0xff]  ;;  %v1629_v10 = vld [vmem:[#allocation7 + $0x70] sm:$0xff]  ;;  %p1864_p11 = pneg %p1863_p4 }
  0x46   : > { %1097 = vmatpush.bf16.msra.mxu3 %v1630_v8  ;;  %v1618_v11 = vld [vmem:[#allocation7 + $0x18] sm:$0xff]  ;;  %v1628_v12 = vld [vmem:[#allocation7 + $0x68] sm:$0xff]  ;;  %v1617_v13 = vld [vmem:[#allocation7 + $0x10] sm:$0xff] }
  0x47   : > { %583 = vmatpush.bf16.msra.mxu0 %v1593_v16  ;;  %v1394_v14 = vld [vmem:[%s2102_s11 + $0x60] sm:$0xf]  ;;  %v1587_v16 = vld [vmem:[%s2102_s11 + $0x64] sm:$0xf]  ;;  %v1625_v24 = vld [vmem:[#allocation7 + $0x50] sm:$0xff] }
  0x48   : > { %724 = vperm.xlu0 %1751, %v682_v15   ;;  %632 = vmatpush.bf16.msra.mxu1 %v1601_v17  ;;  %v1588_v15 = vld [vmem:[%s2102_s11 + $0x64] sm:$0xf0]  ;;  %v1396_v17 = vld [vmem:[%s2102_s11 + $0x68] sm:$0xf0]  ;;  %v1607_v25 = vld [vmem:[%s2070_s7] sm:$0xff] }
  0x49   : > { %729 = vperm.xlu1 %1752, %v683_v18   ;;  %1050 = vmatpush.bf16.msra.mxu2 %v1620_v1  ;;  %v1627_v18 = vld [vmem:[#allocation7 + $0x60] sm:$0xff]  ;;  %v1624_v26 = vld [vmem:[#allocation7 + $0x48] sm:$0xff]  ;;  %v1402_v27 = vld [vmem:[%s2102_s11 + $0x70] sm:$0xf] }
  0x4a   : > { %1098 = vmatpush.bf16.msra.mxu3 %v1629_v10  ;;  %v1611_v8 = vld [vmem:[%s2070_s7 + $0x20] sm:$0xff] }
  0x4b   : > { %584 = vmatpush.bf16.msra.mxu0 %v1592_v19  ;;  %v1395_v19 = vor.u32 %v1588_v15, %v1394_v14 }
  0x4c   : > { %633 = vmatpush.bf16.msra.mxu1 %v1600_v20  ;;  %v1399_v20 = vor.u32 %v1587_v16, %v1396_v17 }
  0x4d   : > { %734 = vperm.xlu2 %1753, %v684_v42   ;;  %1051 = vmatpush.bf16.msra.mxu2 %v1619_v9 }
  0x4e   : > { %1099 = vmatpush.bf16.msra.mxu3 %v1628_v12 }
  0x4f   : > { %585 = vmatpush.bf16.msra.mxu0 %v1591_v22  ;;  %v1626_v22 = vld [vmem:[#allocation7 + $0x58] sm:$0xff] }
  0x50   : > { %739 = vperm.xlu0 %1751, %v685_v21   ;;  %634 = vmatpush.bf16.msra.mxu1 %v1599_v23  ;;  %v1616_v21 = vld [vmem:[#allocation7 + $0x8] sm:$0xff]  ;;  %v1615_v23 = vld [vmem:[#allocation7] sm:$0xff] }
  0x51   : > { %744 = vperm.xlu1 %1752, %v686_v28   ;;  %1052 = vmatpush.bf16.msra.mxu2 %v1618_v11  ;;  %v1590_v28 = vld [vmem:[%s2102_s11 + $0x74] sm:$0xf0] }
  0x52   : > { %586 = vmatmul.bf16.vlgmr.msra.gmra.mxu0 %v1347_v29  ;;  %1100 = vmatpush.bf16.msra.mxu3 %v1627_v18  ;;  %v1589_v29 = vld [vmem:[%s2102_s11 + $0x74] sm:$0xf]  ;;  %v1403_v32 = vor.u32 %v1590_v28, %v1402_v27 }
  0x53   : > { %635 = vmatmul.bf16.vlgmr.msra.gmra.mxu1 %v1351_v30  ;;  %v1404_v30 = vld [vmem:[%s2102_s11 + $0x78] sm:$0xf0]  ;;  %s1865_s11 = scalar_lea.hbm %s2227_s6, 128 }
  0x54   : > { %p1867_p9 = scmp.lt.s32.totalorder %s1865_s11, %s1861_s20 }
  0x55   : > { %749 = vperm.xlu2 %1753, %v687_v43   ;;  %1053 = vmatpush.bf16.msra.mxu2 %v1617_v13 }
  0x56   : > { %1101 = vmatpush.bf16.msra.mxu3 %v1626_v22  ;;  %p1868_p10 = por %p1867_p9, %p1866_p2 }
  0x58   : > { %754 = vperm.xlu0 %1751, %v688_v31   ;;  %v1623_v31 = vld [vmem:[#allocation7 + $0x40] sm:$0xff]  ;;  %p1869_p12 = pnand %p1868_p10, %p1864_p11 }
  0x59   : > { %759 = vperm.xlu1 %1752, %v689_v33   ;;  %1054 = vmatpush.bf16.msra.mxu2 %v1616_v21  ;;  %v1407_v33 = vor.u32 %v1589_v29, %v1404_v30 }
  0x5a   : > { %1102 = vmatpush.bf16.msra.mxu3 %v1625_v24  ;;  %v1612_v24 = vld [vmem:[%s2070_s7 + $0x28] sm:$0xff] }
  0x5d   : > { %764 = vperm.xlu2 %1753, %v690_v50   ;;  %1055 = vmatpush.bf16.msra.mxu2 %v1615_v23 }
  0x5e   : > { %1103 = vmatpush.bf16.msra.mxu3 %v1624_v26 }
  0x60   : > { %769 = vperm.xlu0 %1751, %v691_v34   ;;  %1056 = vmatmul.bf16.vlgmr.msra.gmra.mxu2 %v1607_v25  ;;  %v1608_v34 = vld [vmem:[%s2070_s7 + $0x8] sm:$0xff] }
  0x62   : > { %591 = vmatmul.bf16.gmra.mxu0 %v1355_v40  ;;  %1104 = vmatpush.bf16.msra.mxu3 %v1623_v31  ;;  %v1609_v40 = vld [vmem:[%s2070_s7 + $0x10] sm:$0xff] }
  0x63   : > { %640 = vmatmul.bf16.gmra.mxu1 %v1359_v41 }
  0x70   : > { %1061 = vmatmul.bf16.gmra.mxu2 %v1608_v34 }
  0x72   : > { %596 = vmatmul.bf16.gmra.mxu0 %v1363_v48 }
  0x73   : > { %645 = vmatmul.bf16.gmra.mxu1 %v1367_v49 }
  0x80   : > { %1066 = vmatmul.bf16.gmra.mxu2 %v1609_v40  ;;  %v1613_v40 = vld [vmem:[%s2070_s7 + $0x30] sm:$0xff] }
  0x82   : > { %601 = vmatmul.bf16.gmra.mxu0 %v1371_v55 }
  0x83   : > { %650 = vmatmul.bf16.gmra.mxu1 %v1375_v56  ;;  %v1610_v56 = vld [vmem:[%s2070_s7 + $0x18] sm:$0xff] }
  0x90   : > { %1071 = vmatmul.bf16.gmra.mxu2 %v1610_v56  ;;  %v1614_v56 = vld [vmem:[%s2070_s7 + $0x38] sm:$0xff] }
  0x92   : > { %606 = vmatmul.bf16.gmra.mxu0 %v1379_v61 }
  0x93   : > { %655 = vmatmul.bf16.gmra.mxu1 %v1383_v62 }
  0x97   : > { %v715_v0 = vpop.permute.xlu2 %714 }
  0x9f   : > { %v720_v12 = vpop.permute.xlu2 %719 }
  0xa0   : > { %1076 = vmatmul.bf16.gmra.mxu2 %v1611_v8 }
  0xa2   : > { %611 = vmatmul.bf16.gmra.mxu0 %v1387_v6 }
  0xa3   : > { %660 = vmatmul.bf16.gmra.mxu1 %v1391_v7 }
  0xaa   : > { %v695_v35 = vpop.permute.xlu0 %694 }
  0xab   : > { %v705_v48 = vpop.permute.xlu1 %704 }
  0xb0   : > { %1081 = vmatmul.bf16.gmra.mxu2 %v1612_v24 }
  0xb2   : > { %616 = vmatmul.bf16.gmra.mxu0 %v1395_v19  ;;  %v700_v44 = vpop.permute.xlu0 %699 }
  0xb3   : > { %665 = vmatmul.bf16.gmra.mxu1 %v1399_v20  ;;  %v710_v60 = vpop.permute.xlu1 %709 }
  0xba   : > { %v725_v22 = vpop.permute.xlu0 %724 }
  0xbb   : > { %v730_v28 = vpop.permute.xlu1 %729 }
  0xc0   : > { %1086 = vmatmul.bf16.gmra.mxu2 %v1613_v40 }
  0xc2   : > { %621 = vmatmul.bf16.gmra.mxu0 %v1403_v32 }
  0xc3   : > { %670 = vmatmul.bf16.gmra.mxu1 %v1407_v33 }
  0xcf   : > { %v587_v36 = vpop.f32.mrf.mxu0 }
  0xd0   : > { %v636_v37 = vpop.f32.mrf.mxu1  ;;  %1091 = vmatmul.bf16.gmra.mxu2 %v1614_v56 }
  0xd1   : > { %v637_v38 = vadd.f32 %v636_v37, %v587_v36 }
  0xd3   : > { %v772_v39 = vmul.f32 %v695_v35, %v637_v38  ;;  %v735_v38 = vpop.permute.xlu2 %734 }
  0xd5   : > { %v804_v45 = vpack.c.bf16 %v772_v39, %v772_v39 }
  0xd7   : > { %v589_v41 = vpop.f32.mrf.mxu0  ;;  %v884_v49 = vunpack.c.l.b16 %v804_v45 }
  0xd8   : > { %v638_v42 = vpop.f32.mrf.mxu1 }
  0xd9   : > { %v639_v43 = vadd.f32 %v638_v42, %v589_v41 }
  0xdb   : > { %v773_v46 = vmul.f32 %v700_v44, %v639_v43  ;;  %v740_v44 = vpop.permute.xlu0 %739 }
  0xdd   : > { %v805_v47 = vpack.c.bf16 %v773_v46, %v773_v46 }
  0xdf   : > { %v885_v50 = vunpack.c.l.b16 %v805_v47  ;;  %v592_v51 = vpop.f32.mrf.mxu0 }
  0xe0   : > { %v641_v52 = vpop.f32.mrf.mxu1 }
  0xe1   : > { %v900_v53 = vpack.c.b16 %v885_v50, %v884_v49  ;;  %v642_v54 = vadd.f32 %v641_v52, %v592_v51 }
  0xe3   : > { %1105 = vmatmul.bf16.vlgmr.msra.gmra.mxu3 %v900_v53  ;;  %v774_v55 = vmul.f32 %v705_v48, %v642_v54  ;;  %v745_v54 = vpop.permute.xlu1 %744 }
  0xe5   : > { %v806_v61 = vpack.c.bf16 %v774_v55, %v774_v55 }
  0xe7   : > { %v594_v57 = vpop.f32.mrf.mxu0  ;;  %v886_v1 = vunpack.c.l.b16 %v806_v61 }
  0xe8   : > { %v643_v58 = vpop.f32.mrf.mxu1 }
  0xe9   : > { %v644_v59 = vadd.f32 %v643_v58, %v594_v57 }
  0xeb   : > { %v775_v62 = vmul.f32 %v710_v60, %v644_v59  ;;  %v750_v60 = vpop.permute.xlu2 %749 }
  0xed   : > { %v807_v63 = vpack.c.bf16 %v775_v62, %v775_v62 }
  0xef   : > { %v887_v2 = vunpack.c.l.b16 %v807_v63  ;;  %v597_v3 = vpop.f32.mrf.mxu0 }
  0xf0   : > { %v646_v4 = vpop.f32.mrf.mxu1 }
  0xf1   : > { %v901_v5 = vpack.c.b16 %v887_v2, %v886_v1  ;;  %v647_v6 = vadd.f32 %v646_v4, %v597_v3 }
  0xf3   : > { %1110 = vmatmul.bf16.gmra.mxu3 %v901_v5  ;;  %v776_v7 = vmul.f32 %v715_v0, %v647_v6  ;;  %v755_v6 = vpop.permute.xlu0 %754 }
  0xf5   : > { %v808_v13 = vpack.c.bf16 %v776_v7, %v776_v7 }
  0xf7   : > { %v599_v9 = vpop.f32.mrf.mxu0  ;;  %v888_v16 = vunpack.c.l.b16 %v808_v13 }
  0xf8   : > { %v648_v10 = vpop.f32.mrf.mxu1 }
  0xf9   : > { %v649_v11 = vadd.f32 %v648_v10, %v599_v9 }
  0xfb   : > { %v777_v14 = vmul.f32 %v720_v12, %v649_v11  ;;  %v760_v11 = vpop.permute.xlu1 %759 }
  0xfd   : > { %v809_v15 = vpack.c.bf16 %v777_v14, %v777_v14 }
  0xff   : > { %v889_v17 = vunpack.c.l.b16 %v809_v15  ;;  %v602_v18 = vpop.f32.mrf.mxu0 }
 0x100   : > { %v651_v19 = vpop.f32.mrf.mxu1 }
 0x101   : > { %v902_v20 = vpack.c.b16 %v889_v17, %v888_v16  ;;  %v652_v21 = vadd.f32 %v651_v19, %v602_v18 }
 0x103   : > { %1115 = vmatmul.bf16.gmra.mxu3 %v902_v20  ;;  %v778_v23 = vmul.f32 %v725_v22, %v652_v21  ;;  %v1057_v21 = vpop.f32.mrf.mxu2  ;;  %v765_v22 = vpop.permute.xlu2 %764 }
 0x105   : > { %v810_v29 = vpack.c.bf16 %v778_v23, %v778_v23 }
 0x107   : > { %v604_v25 = vpop.f32.mrf.mxu0  ;;  %v890_v32 = vunpack.c.l.b16 %v810_v29 }
 0x108   : > { %v653_v26 = vpop.f32.mrf.mxu1 }
 0x109   : > { %v654_v27 = vadd.f32 %v653_v26, %v604_v25 }
 0x10b   : > { %v779_v30 = vmul.f32 %v730_v28, %v654_v27  ;;  %v770_v27 = vpop.permute.xlu0 %769 }
 0x10d   : > { %v811_v31 = vpack.c.bf16 %v779_v30, %v779_v30 }
 0x10f   : > { %v891_v33 = vunpack.c.l.b16 %v811_v31  ;;  %v607_v34 = vpop.f32.mrf.mxu0  ;;  %v1059_v31 = vpop.f32.mrf.mxu2 }
 0x110   : > { %v656_v35 = vpop.f32.mrf.mxu1 }
 0x111   : > { %v903_v36 = vpack.c.b16 %v891_v33, %v890_v32  ;;  %v657_v37 = vadd.f32 %v656_v35, %v607_v34 }
 0x113   : > { %1120 = vmatmul.bf16.gmra.mxu3 %v903_v36  ;;  %v780_v39 = vmul.f32 %v735_v38, %v657_v37  ;;  %v2157_v37 = vld [vmem:[%s2226_s5] ss:$0 sm:$0xff] }
 0x115   : > { %v812_v45 = vpack.c.bf16 %v780_v39, %v780_v39  ;;  %v1058_v39 = vadd.f32 %v2157_v37, %v1057_v21 }
 0x117   : > { %v609_v41 = vpop.f32.mrf.mxu0  ;;  %v892_v48 = vunpack.c.l.b16 %v812_v45  ;;  %v1062_v35 = vpop.f32.mrf.mxu2 }
 0x118   : > { %v658_v42 = vpop.f32.mrf.mxu1 }
 0x119   : > { %v659_v43 = vadd.f32 %v658_v42, %v609_v41  ;;  %v1060_v41 = vadd.f32 %v2157_v37, %v1059_v31 }
 0x11b   : > { %v781_v46 = vmul.f32 %v740_v44, %v659_v43 }
 0x11d   : > { %v813_v47 = vpack.c.bf16 %v781_v46, %v781_v46 }
 0x11f   : > { %v893_v49 = vunpack.c.l.b16 %v813_v47  ;;  %v612_v50 = vpop.f32.mrf.mxu0  ;;  %v1064_v36 = vpop.f32.mrf.mxu2 }
 0x120   : > { %v661_v51 = vpop.f32.mrf.mxu1 }
 0x121   : > { %v904_v52 = vpack.c.b16 %v893_v49, %v892_v48  ;;  %v662_v53 = vadd.f32 %v661_v51, %v612_v50  ;;  %v1063_v50 = vadd.f32 %v2157_v37, %v1062_v35  ;;  %v1065_v51 = vadd.f32 %v2157_v37, %v1064_v36 }
 0x123   : > { %1125 = vmatmul.bf16.gmra.mxu3 %v904_v52  ;;  %v782_v55 = vmul.f32 %v745_v54, %v662_v53 }
 0x125   : > { %v814_v61 = vpack.c.bf16 %v782_v55, %v782_v55 }
 0x127   : > { %v614_v57 = vpop.f32.mrf.mxu0  ;;  %v894_v0 = vunpack.c.l.b16 %v814_v61  ;;  %v1067_v40 = vpop.f32.mrf.mxu2 }
 0x128   : > { %v663_v58 = vpop.f32.mrf.mxu1 }
 0x129   : > { %v664_v59 = vadd.f32 %v663_v58, %v614_v57 }
 0x12b   : > { %v783_v62 = vmul.f32 %v750_v60, %v664_v59  ;;  %v1068_v60 = vadd.f32 %v2157_v37, %v1067_v40 }
 0x12d   : > { %v815_v63 = vpack.c.bf16 %v783_v62, %v783_v62 }
 0x12f   : > { %v895_v1 = vunpack.c.l.b16 %v815_v63  ;;  %v617_v2 = vpop.f32.mrf.mxu0  ;;  %v1069_v49 = vpop.f32.mrf.mxu2 }
 0x130   : > { %v666_v3 = vpop.f32.mrf.mxu1  ;;  %v1070_v62 = vadd.f32 %v2157_v37, %v1069_v49 }
 0x131   : > { %v905_v4 = vpack.c.b16 %v895_v1, %v894_v0  ;;  %v667_v5 = vadd.f32 %v666_v3, %v617_v2 }
 0x133   : > { %1130 = vmatmul.bf16.gmra.mxu3 %v905_v4  ;;  %v784_v7 = vmul.f32 %v755_v6, %v667_v5 }
 0x135   : > { %v816_v12 = vpack.c.bf16 %v784_v7, %v784_v7 }
 0x137   : > { %v619_v8 = vpop.f32.mrf.mxu0  ;;  %v896_v15 = vunpack.c.l.b16 %v816_v12  ;;  %v1072_v55 = vpop.f32.mrf.mxu2 }
 0x138   : > { %v668_v9 = vpop.f32.mrf.mxu1  ;;  %v1073_v7 = vadd.f32 %v2157_v37, %v1072_v55 }
 0x139   : > { %v669_v10 = vadd.f32 %v668_v9, %v619_v8 }
 0x13b   : > { %v785_v13 = vmul.f32 %v760_v11, %v669_v10 }
 0x13d   : > { %v817_v14 = vpack.c.bf16 %v785_v13, %v785_v13 }
 0x13f   : > { %v897_v16 = vunpack.c.l.b16 %v817_v14  ;;  %v622_v17 = vpop.f32.mrf.mxu0  ;;  %v1074_v61 = vpop.f32.mrf.mxu2 }
 0x140   : > { %v671_v18 = vpop.f32.mrf.mxu1  ;;  %v1075_v8 = vadd.f32 %v2157_v37, %v1074_v61 }
 0x141   : > { %v906_v19 = vpack.c.b16 %v897_v16, %v896_v15  ;;  %v672_v20 = vadd.f32 %v671_v18, %v622_v17 }
 0x143   : > { %1135 = vmatmul.bf16.gmra.mxu3 %v906_v19  ;;  %v786_v23 = vmul.f32 %v765_v22, %v672_v20 }
 0x145   : > { %v818_v28 = vpack.c.bf16 %v786_v23, %v786_v23 }
 0x147   : > { %v624_v24 = vpop.f32.mrf.mxu0  ;;  %v898_v32 = vunpack.c.l.b16 %v818_v28  ;;  %v1077_v5 = vpop.f32.mrf.mxu2 }
 0x148   : > { %v673_v25 = vpop.f32.mrf.mxu1  ;;  %v1078_v18 = vadd.f32 %v2157_v37, %v1077_v5 }
 0x149   : > { %v674_v26 = vadd.f32 %v673_v25, %v624_v24 }
 0x14b   : > { %v787_v29 = vmul.f32 %v770_v27, %v674_v26 }
 0x14d   : > { %v819_v30 = vpack.c.bf16 %v787_v29, %v787_v29 }
 0x14f   : > { %v899_v33 = vunpack.c.l.b16 %v819_v30  ;;  %v1079_v11 = vpop.f32.mrf.mxu2 }
 0x150   : > { %v1080_v19 = vadd.f32 %v2157_v37, %v1079_v11 }
 0x151   : > { %v907_v34 = vpack.c.b16 %v899_v33, %v898_v32 }
 0x153   : > { %1140 = vmatmul.bf16.gmra.mxu3 %v907_v34 }
 0x157   : > { %v1082_v17 = vpop.f32.mrf.mxu2 }
 0x158   : > { %v1083_v28 = vadd.f32 %v2157_v37, %v1082_v17 }
 0x15f   : > { %v1084_v25 = vpop.f32.mrf.mxu2 }
 0x160   : > { %v1085_v30 = vadd.f32 %v2157_v37, %v1084_v25 }
 0x166   : > { %v1106_v38 = vpop.f32.mrf.mxu3 }
 0x167   : > { %v1107_v42 = vadd.f32 %v1106_v38, %v1058_v39  ;;  %v1087_v29 = vpop.f32.mrf.mxu2 }
 0x168   : > { %v1088_v40 = vadd.f32 %v2157_v37, %v1087_v29 }
 0x169   : > { %v1146_v45 = vmax.f32 %v1107_v42, 0.0 }
 0x16e   : > { %v1108_v43 = vpop.f32.mrf.mxu3 }
 0x16f   : > { %v1109_v44 = vadd.f32 %v1108_v43, %v1060_v41  ;;  %v1089_v38 = vpop.f32.mrf.mxu2 }
 0x170   : > { %v1090_v41 = vadd.f32 %v2157_v37, %v1089_v38 }
 0x171   : > { %v1147_v46 = vmax.f32 %v1109_v44, 0.0 }
 0x173   : > { %v1635_v47 = vpack.c.bf16 %v1147_v46, %v1146_v45 }
 0x175   : > { %1636 = vst [vmem:[%s2163_s13] sm:$0xff] %v1635_v47  }
 0x176   : > { %v1111_v48 = vpop.f32.mrf.mxu3 }
 0x177   : > { %v1112_v52 = vadd.f32 %v1111_v48, %v1063_v50  ;;  %v1092_v45 = vpop.f32.mrf.mxu2 }
 0x178   : > { %v1093_v50 = vadd.f32 %v2157_v37, %v1092_v45 }
 0x179   : > { %v1148_v56 = vmax.f32 %v1112_v52, 0.0 }
 0x17e   : > { %v1113_v53 = vpop.f32.mrf.mxu3 }
 0x17f   : > { %v1114_v54 = vadd.f32 %v1113_v53, %v1065_v51  ;;  %v1094_v51 = vpop.f32.mrf.mxu2 }
 0x180   : > { %v1095_v52 = vadd.f32 %v2157_v37, %v1094_v51 }
 0x181   : > { %v1149_v57 = vmax.f32 %v1114_v54, 0.0 }
 0x183   : > { %v1640_v58 = vpack.c.bf16 %v1149_v57, %v1148_v56 }
 0x185   : > { %1672 = vst [vmem:[%s2163_s13 + $0x8] sm:$0xff] %v1640_v58  }
 0x186   : > { %v1116_v59 = vpop.f32.mrf.mxu3 }
 0x187   : > { %v1117_v63 = vadd.f32 %v1116_v59, %v1068_v60 }
 0x189   : > { %v1150_v2 = vmax.f32 %v1117_v63, 0.0 }
 0x18e   : > { %v1118_v0 = vpop.f32.mrf.mxu3 }
 0x18f   : > { %v1119_v1 = vadd.f32 %v1118_v0, %v1070_v62 }
 0x191   : > { %v1151_v3 = vmax.f32 %v1119_v1, 0.0 }
 0x193   : > { %v1645_v4 = vpack.c.bf16 %v1151_v3, %v1150_v2 }
 0x195   : > { %1673 = vst [vmem:[%s2163_s13 + $0x10] sm:$0xff] %v1645_v4  }
 0x196   : > { %v1121_v6 = vpop.f32.mrf.mxu3 }
 0x197   : > { %v1122_v9 = vadd.f32 %v1121_v6, %v1073_v7 }
 0x199   : > { %v1152_v13 = vmax.f32 %v1122_v9, 0.0 }
 0x19e   : > { %v1123_v10 = vpop.f32.mrf.mxu3 }
 0x19f   : > { %v1124_v12 = vadd.f32 %v1123_v10, %v1075_v8 }
 0x1a1   : > { %v1153_v14 = vmax.f32 %v1124_v12, 0.0 }
 0x1a3   : > { %v1650_v15 = vpack.c.bf16 %v1153_v14, %v1152_v13 }
 0x1a5   : > { %1674 = vst [vmem:[%s2163_s13 + $0x18] sm:$0xff] %v1650_v15  }
 0x1a6   : > { %v1126_v16 = vpop.f32.mrf.mxu3 }
 0x1a7   : > { %v1127_v20 = vadd.f32 %v1126_v16, %v1078_v18 }
 0x1a9   : > { %v1154_v23 = vmax.f32 %v1127_v20, 0.0 }
 0x1ae   : > { %v1128_v21 = vpop.f32.mrf.mxu3 }
 0x1af   : > { %v1129_v22 = vadd.f32 %v1128_v21, %v1080_v19 }
 0x1b1   : > { %v1155_v24 = vmax.f32 %v1129_v22, 0.0 }
 0x1b3   : > { %v1655_v26 = vpack.c.bf16 %v1155_v24, %v1154_v23 }
 0x1b5   : > { %1675 = vst [vmem:[%s2163_s13 + $0x20] sm:$0xff] %v1655_v26  }
 0x1b6   : > { %v1131_v27 = vpop.f32.mrf.mxu3 }
 0x1b7   : > { %v1132_v31 = vadd.f32 %v1131_v27, %v1083_v28 }
 0x1b9   : > { %v1156_v34 = vmax.f32 %v1132_v31, 0.0 }
 0x1be   : > { %v1133_v32 = vpop.f32.mrf.mxu3 }
 0x1bf   : > { %v1134_v33 = vadd.f32 %v1133_v32, %v1085_v30 }
 0x1c1   : > { %v1157_v35 = vmax.f32 %v1134_v33, 0.0 }
 0x1c3   : > { %v1660_v36 = vpack.c.bf16 %v1157_v35, %v1156_v34 }
 0x1c5   : > { %1676 = vst [vmem:[%s2163_s13 + $0x28] sm:$0xff] %v1660_v36  }
 0x1c6   : > { %v1136_v39 = vpop.f32.mrf.mxu3 }
 0x1c7   : > { %v1137_v42 = vadd.f32 %v1136_v39, %v1088_v40 }
 0x1c9   : > { %v1158_v46 = vmax.f32 %v1137_v42, 0.0 }
 0x1ce   : > { %v1138_v43 = vpop.f32.mrf.mxu3 }
 0x1cf   : > { %v1139_v44 = vadd.f32 %v1138_v43, %v1090_v41 }
 0x1d1   : > { %v1159_v47 = vmax.f32 %v1139_v44, 0.0 }
 0x1d3   : > { %v1665_v48 = vpack.c.bf16 %v1159_v47, %v1158_v46 }
 0x1d5   : > { %1677 = vst [vmem:[%s2163_s13 + $0x30] sm:$0xff] %v1665_v48  }
 0x1d6   : > { %v1141_v49 = vpop.f32.mrf.mxu3 }
 0x1d7   : > { %v1142_v53 = vadd.f32 %v1141_v49, %v1093_v50 }
 0x1d9   : > { %v1160_v56 = vmax.f32 %v1142_v53, 0.0 }
 0x1de   : > { %v1143_v54 = vpop.f32.mrf.mxu3 }
 0x1df   : > { %v1144_v55 = vadd.f32 %v1143_v54, %v1095_v52 }
 0x1e1   : > { %v1161_v57 = vmax.f32 %v1144_v55, 0.0 }
 0x1e3   : > { %v1670_v58 = vpack.c.bf16 %v1161_v57, %v1160_v56 }
 0x1e5   : > { %1678 = vst [vmem:[%s2163_s13 + $0x38] sm:$0xff] %v1670_v58  }
 0x1e6   : > { %1872 = shalt.err (!%p1869_p12)
}
 0x1e7   : > { %s1922_s9 = smov 64   ;;  %s1923_s13 = smov 4  }
 0x1e8   : > { %1689 = dma.vmem_to_hbm [thread:$0]  (%p2031_p3), %s1208_s16, 1024, %s1210_s27, %s1195_s25, %s1922_s9, %s1922_s9, %s1923_s13  }
 0x1e9 PF: > { %s1224_s14 = sand.u32 1, %s1903_s21   ;;  %p2237_p13 = scmp.ge.s32.totalorder %s1915_s24, 2 }
 0x1ea   : > { %s1225_s15 = scalar_lea.sflag [#allocation4], %s1224_s14 }
 0x1eb   : > { %p1703_p0 = pnand %p2237_p13, %p1994_p6 }
 0x1ed   : > { %p1704_p5 = pneg %p1703_p0 }
 0x1ef   : > { %1898 = dma.done.wait (%p1704_p5), %s1225_s15, 1024  }
 0x1f0   : > { %1900 = vsyncadd (%p1704_p5), %s1225_s15, 4294966272  ;;  %p20_p7 = scmp.ge.s32.totalorder %s2021_s18, 4   ;;  %s2238_s21 = smov %s1907_s22 }
 0x1f1   : > { %s2239_s22 = smov %s1911_s23  ;;  %s2240_s23 = smov %s2037_s29 }
 0x1f2   : > { %s2241_s24 = smov %s2021_s18  ;;  %22 = sbr.rel (!%p20_p7) target bundleno = 6 (0x6), region = 103 }
 0x1f7   :  { %1231 = vsyncpa [#allocation3], 1 }
 0x1f8   :  { %1233 = vsyncpa [#allocation3 + $0x1], 1 }
 0x1f9   :  { %1234 = vsyncpa [#allocation6], 1 }
 0x1fa   :  { %1235 = vsyncpa [#allocation4], 1 }
 0x1fb   :  { %1237 = vsyncpa [#allocation4 + $0x1], 1 }

</bundles_post_ra>
